<compile_context>
chip_gen: v7x
topology: tpu7x:2x2x1
jax: 0.10.0
libtpu: 0.0.40
codegen_flags: <defaults>
</compile_context>

<pallas_src>
import jax
import jax.numpy as jnp
from jax import lax
from jax.experimental import pallas as pl
from jax.experimental.pallas import tpu as pltpu

NUM_CLASSES = 7
_PADDED_OUT = 128          # lane-dense output width (>= NUM_CLASSES)


def _round_up(x, m):
    return ((x + m - 1) // m) * m


def _head_kernel(x_ref, w1_ref, b1_ref, w2_ref, b2_ref, o_ref):
    """One batch tile of the classifier head.

    x_ref:  (tb, H) CLS rows           (2-D fused-fetch path), or
            (tb, sb, H) seq window containing the CLS row (fallback path)
    w1_ref: (H, H)        dense.weight, PyTorch (out, in) layout (VMEM resident)
    b1_ref: (1, H)        dense.bias (f32)
    w2_ref: (128, H)      out_proj.weight, (out, in), lane-padded 7 -> 128
    b2_ref: (1, 128)      out_proj.bias, lane-padded (f32)
    o_ref:  (tb, 128)     lane-dense logits tile (f32)
    """
    cdt = w1_ref.dtype                              # compute dtype (bf16 or f32)
    if len(x_ref.shape) == 3:
        x = x_ref[:, 0, :]                          # slice the Ref: load CLS rows only
    else:
        x = x_ref[...]                              # block already holds exactly the CLS rows
    x = x.astype(cdt)
    # dropout is identity at inference.
    # TODO(synk): training-mode dropout (pltpu.prng_random_bits mask) not emitted.

    # h = tanh(x @ W1^T + b1); contracting dim 1 of both operands avoids
    # materializing W1^T.  Accumulate in f32 on the MXU.
    h = lax.dot_general(x, w1_ref[...], (((1,), (1,)), ((), ())),
                        preferred_element_type=jnp.float32)
    h = jnp.tanh(h + b1_ref[...])                   # bias + tanh in f32 (EUP)

    y = lax.dot_general(h.astype(cdt), w2_ref[...], (((1,), (1,)), ((), ())),
                        preferred_element_type=jnp.float32)
    o_ref[...] = (y + b2_ref[...]).astype(o_ref.dtype)   # lane-dense 128-wide store


def prepare_params(w_dense, b_dense, w_out, b_out, compute_dtype=jnp.bfloat16):
    """One-time (init-time) parameter prep — call once, not per forward.

    Keeps the PyTorch (out, in) layout (no runtime transpose), lane-pads
    out_proj from 7 to 128 outputs, and casts the matmul weights to the
    compute dtype (bf16 by default — the MXU is bf16-native on all targets;
    bias / tanh / accumulation stay f32 inside the kernel)."""
    # TODO(synk): optional fp8 W1 (+ per-channel scale folded post-matmul) for
    # the weight-bound small-B regime on v7x; not emitted here.
    H = w_dense.shape[0]
    w1 = jnp.asarray(w_dense, compute_dtype)                              # (H, H)
    b1 = jnp.asarray(b_dense, jnp.float32).reshape(1, H)                  # (1, H)
    w2 = jnp.zeros((_PADDED_OUT, H), compute_dtype).at[:NUM_CLASSES, :].set(
        jnp.asarray(w_out, compute_dtype))                                # (128, H)
    b2 = jnp.zeros((1, _PADDED_OUT), jnp.float32).at[0, :NUM_CLASSES].set(
        jnp.asarray(b_out, jnp.float32))                                  # (1, 128)
    return w1, b1, w2, b2


def anxiety_classifier_forward(features, params, *, block_b=512):
    """features: (B, S, H).  params: output of prepare_params()."""
    w1, b1, w2, b2 = params
    B, S, H = features.shape
    feat_isz = features.dtype.itemsize
    align = max(8, 32 // feat_isz)        # sublane packing tile for feature dtype

    # Batch tile: large (amortize ~0.35us/step), but keep >= 2 grid steps when
    # B is big so the "parallel" batch axis can shard across TCs (v7x/megacore).
    tb = min(block_b, B, max(align, _round_up(pl.cdiv(B, 2), align)))
    grid = (pl.cdiv(B, tb),)

    if H % 128 == 0:
        # Fused CLS fetch: row-major (B, S, H) reshaped to (B, S*H) is
        # metadata-only; columns [0:H] of row b are exactly features[b, 0, :].
        feats = features.reshape(B, S * H)
        feat_spec = pl.BlockSpec((tb, H), lambda i: (i, 0))
        feat_block_elems = tb * H
        feat_hbm_bytes = B * H * feat_isz
    else:
        # Fallback: sublane-aligned seq window holding the CLS row; the kernel
        # slices the Ref so only the CLS rows are actually loaded into vregs.
        sb = min(S, align)
        feats = features
        feat_spec = pl.BlockSpec((tb, sb, H), lambda i: (i, 0, 0))
        feat_block_elems = tb * sb * H
        feat_hbm_bytes = B * sb * H * feat_isz

    # Weights / biases: whole-array, single-buffered, VMEM-resident operands.
    resident = pl.BlockSpec(memory_space=pltpu.MemorySpace.VMEM)

    w_isz = jnp.dtype(w1.dtype).itemsize
    weight_hbm_bytes = (H * H + _PADDED_OUT * H) * w_isz + (H + _PADDED_OUT) * 4
    weight_vmem_bytes = ((H * H + _PADDED_OUT * H) * w_isz
                         + 8 * (H + _PADDED_OUT) * 4)      # biases pad to 8 sublanes
    block_vmem_bytes = feat_block_elems * feat_isz + tb * _PADDED_OUT * 4
    # Single-buffered weights + double-buffered per-block activations + margin,
    # capped at 64 MiB so the request is valid on v7x as well.
    vmem_limit = int(min(64 * 1024 * 1024,
                         max(16 * 1024 * 1024,
                             weight_vmem_bytes + 2 * block_vmem_bytes + (4 << 20))))
    # TODO(synk): for H large enough that W1 overflows this budget (e.g.
    # H >= 4096 bf16 on v7x's 64 MiB VMEM), add a K-tiling grid axis with an
    # f32 accumulator (pl.when init/finalize) instead of a fully resident W1.

    cost = pl.CostEstimate(
        flops=2 * B * H * H + 2 * B * H * _PADDED_OUT,
        transcendentals=B * H,
        bytes_accessed=weight_hbm_bytes + feat_hbm_bytes + B * _PADDED_OUT * 4,
    )

    out = pl.pallas_call(
        _head_kernel,
        out_shape=jax.ShapeDtypeStruct((B, _PADDED_OUT), jnp.float32),
        grid=grid,
        in_specs=[feat_spec, resident, resident, resident, resident],
        out_specs=pl.BlockSpec((tb, _PADDED_OUT), lambda i: (i, 0)),
        compiler_params=pltpu.CompilerParams(
            dimension_semantics=("parallel",),
            vmem_limit_bytes=vmem_limit,
        ),
        cost_estimate=cost,
    )(feats, w1, b1, w2, b2)

    return out[:, :NUM_CLASSES]     # drop the lane padding (cheap XLA slice)


def _ref_forward(features, w_dense, b_dense, w_out, b_out):
    """Pure-JAX reference mirroring the PyTorch module (eval mode)."""
    x = features[:, 0, :].astype(jnp.float32)
    h = jnp.tanh(lax.dot_general(x, w_dense, (((1,), (1,)), ((), ())),
                                 precision=lax.Precision.HIGHEST) + b_dense)
    return lax.dot_general(h, w_out, (((1,), (1,)), ((), ())),
                           precision=lax.Precision.HIGHEST) + b_out


if __name__ == "__main__":
    key = jax.random.PRNGKey(0)

    def make_case(B, S, H):
        ks = jax.random.split(jax.random.fold_in(key, H), 5)
        features = jax.random.normal(ks[0], (B, S, H), dtype=jnp.float32)
        # PyTorch Linear convention: weight is (out, in).
        w_dense = jax.random.normal(ks[1], (H, H), dtype=jnp.float32) * 0.05
        b_dense = jax.random.normal(ks[2], (H,), dtype=jnp.float32) * 0.05
        w_out = jax.random.normal(ks[3], (NUM_CLASSES, H), dtype=jnp.float32) * 0.05
        b_out = jax.random.normal(ks[4], (NUM_CLASSES,), dtype=jnp.float32) * 0.05
        return features, (w_dense, b_dense, w_out, b_out)

    # --- Case A: hidden=128 (H % 128 == 0) -> fused 2-D CLS-fetch path.
    B, S, H = 4, 8, 128
    feats, raw = make_case(B, S, H)
    ref = _ref_forward(feats, *raw)

    # f32-weight path (tolerance covers MXU multi-pass f32 rounding).
    out_f32 = jax.block_until_ready(
        anxiety_classifier_forward(feats, prepare_params(*raw, jnp.float32)))
    assert out_f32.shape == (B, NUM_CLASSES), out_f32.shape
    assert jnp.allclose(out_f32, ref, atol=2e-3, rtol=2e-3), (out_f32, ref)

    # bf16-weight path (default): bf16 operands, f32 accumulation/bias/tanh.
    out_bf16 = jax.block_until_ready(
        anxiety_classifier_forward(feats, prepare_params(*raw)))
    assert out_bf16.shape == (B, NUM_CLASSES), out_bf16.shape
    assert jnp.allclose(out_bf16, ref, atol=3e-2, rtol=3e-2), (out_bf16, ref)

    # bf16 feature stream (halves the dominant HBM traffic on v6e/v5e).
    out_bf16_feats = jax.block_until_ready(
        anxiety_classifier_forward(feats.astype(jnp.bfloat16), prepare_params(*raw)))
    assert jnp.allclose(out_bf16_feats, ref, atol=5e-2, rtol=5e-2), (out_bf16_feats, ref)

    # --- Case B: hidden=32 (H % 128 != 0) -> 3-D sublane-window fallback path.
    B2, S2, H2 = 2, 8, 32
    feats_b, raw_b = make_case(B2, S2, H2)
    ref_b = _ref_forward(feats_b, *raw_b)
    out_b = jax.block_until_ready(
        anxiety_classifier_forward(feats_b, prepare_params(*raw_b, jnp.float32)))
    assert out_b.shape == (B2, NUM_CLASSES), out_b.shape
    assert jnp.allclose(out_b, ref_b, atol=2e-3, rtol=2e-3), (out_b, ref_b)

    print("KERNEL_OK")
</pallas_src>

<mosaic_0001>
module attributes {stable_mosaic.version = 11 : i64} {
  func.func @_head_kernel(%arg0: i32, %arg1: memref<4x128xf32, #tpu.memory_space<vmem>>, %arg2: memref<128x128xf32, #tpu.memory_space<vmem>>, %arg3: memref<1x128xf32, #tpu.memory_space<vmem>>, %arg4: memref<128x128xf32, #tpu.memory_space<vmem>>, %arg5: memref<1x128xf32, #tpu.memory_space<vmem>>, %arg6: memref<4x128xf32, #tpu.memory_space<vmem>>) attributes {dimension_semantics = [#tpu.dimension_semantics<parallel>], iteration_bounds = array<i64: 1>, scalar_prefetch = 0 : i64, scratch_operands = 0 : i64, tpu.core_type = #tpu.core_type<tc>, window_params = [{transform_indices = @transform_0, window_bounds = array<i64: 4, 128>}, {pipeline_mode = #tpu.pipeline_mode<synchronous>, transform_indices = @transform_1, window_bounds = array<i64: 128, 128>}, {pipeline_mode = #tpu.pipeline_mode<synchronous>, transform_indices = @transform_2, window_bounds = array<i64: 1, 128>}, {pipeline_mode = #tpu.pipeline_mode<synchronous>, transform_indices = @transform_3, window_bounds = array<i64: 128, 128>}, {pipeline_mode = #tpu.pipeline_mode<synchronous>, transform_indices = @transform_4, window_bounds = array<i64: 1, 128>}, {transform_indices = @transform_5, window_bounds = array<i64: 4, 128>}]} {
    %c0 = arith.constant 0 : index
    %c0_0 = arith.constant 0 : index
    %0 = vector.load %arg1[%c0, %c0_0] : memref<4x128xf32, #tpu.memory_space<vmem>>, vector<4x128xf32>
    %c0_1 = arith.constant 0 : index
    %c0_2 = arith.constant 0 : index
    %1 = vector.load %arg2[%c0_1, %c0_2] : memref<128x128xf32, #tpu.memory_space<vmem>>, vector<128x128xf32>
    %cst = arith.constant dense<0.000000e+00> : vector<4x128xf32>
    %2 = tpu.matmul %0, %1, %cst {dimension_numbers = #tpu.dot_dimension_numbers<[1], [1], [0], [0], [0, 0, 1, 0], [], []>} : vector<4x128xf32>, vector<128x128xf32>, vector<4x128xf32> -> vector<4x128xf32>
    %c0_3 = arith.constant 0 : index
    %c0_4 = arith.constant 0 : index
    %3 = vector.load %arg3[%c0_3, %c0_4] : memref<1x128xf32, #tpu.memory_space<vmem>>, vector<1x128xf32>
    %4 = vector.broadcast %3 : vector<1x128xf32> to vector<4x128xf32>
    %5 = arith.addf %2, %4 : vector<4x128xf32>
    %6 = math.tanh %5 : vector<4x128xf32>
    %c0_5 = arith.constant 0 : index
    %c0_6 = arith.constant 0 : index
    %7 = vector.load %arg4[%c0_5, %c0_6] : memref<128x128xf32, #tpu.memory_space<vmem>>, vector<128x128xf32>
    %cst_7 = arith.constant dense<0.000000e+00> : vector<4x128xf32>
    %8 = tpu.matmul %6, %7, %cst_7 {dimension_numbers = #tpu.dot_dimension_numbers<[1], [1], [0], [0], [0, 0, 1, 0], [], []>} : vector<4x128xf32>, vector<128x128xf32>, vector<4x128xf32> -> vector<4x128xf32>
    %c0_8 = arith.constant 0 : index
    %c0_9 = arith.constant 0 : index
    %9 = vector.load %arg5[%c0_8, %c0_9] : memref<1x128xf32, #tpu.memory_space<vmem>>, vector<1x128xf32>
    %10 = vector.broadcast %9 : vector<1x128xf32> to vector<4x128xf32>
    %11 = arith.addf %8, %10 : vector<4x128xf32>
    %c0_10 = arith.constant 0 : index
    %c0_11 = arith.constant 0 : index
    %12 = vector.load %arg6[%c0_10, %c0_11] : memref<4x128xf32, #tpu.memory_space<vmem>>, vector<4x128xf32>
    tpu.vector_store %arg6[%c0_10, %c0_11], %11 {strides = array<i32>} : memref<4x128xf32, #tpu.memory_space<vmem>>, vector<4x128xf32>,
    return
  }
  func.func @transform_0(%arg0: i32) -> (i32, i32) {
    %c0_i32 = arith.constant 0 : i32
    %c0_i32_0 = arith.constant 0 : i32
    return %arg0, %c0_i32 : i32, i32
  }
  func.func @transform_1(%arg0: i32) -> (i32, i32) {
    %c0_i32 = arith.constant 0 : i32
    %c0_i32_0 = arith.constant 0 : i32
    %c0_i32_1 = arith.constant 0 : i32
    return %c0_i32, %c0_i32_0 : i32, i32
  }
  func.func @transform_2(%arg0: i32) -> (i32, i32) {
    %c0_i32 = arith.constant 0 : i32
    %c0_i32_0 = arith.constant 0 : i32
    %c0_i32_1 = arith.constant 0 : i32
    return %c0_i32, %c0_i32_0 : i32, i32
  }
  func.func @transform_3(%arg0: i32) -> (i32, i32) {
    %c0_i32 = arith.constant 0 : i32
    %c0_i32_0 = arith.constant 0 : i32
    %c0_i32_1 = arith.constant 0 : i32
    return %c0_i32, %c0_i32_0 : i32, i32
  }
  func.func @transform_4(%arg0: i32) -> (i32, i32) {
    %c0_i32 = arith.constant 0 : i32
    %c0_i32_0 = arith.constant 0 : i32
    %c0_i32_1 = arith.constant 0 : i32
    return %c0_i32, %c0_i32_0 : i32, i32
  }
  func.func @transform_5(%arg0: i32) -> (i32, i32) {
    %c0_i32 = arith.constant 0 : i32
    %c0_i32_0 = arith.constant 0 : i32
    return %arg0, %c0_i32 : i32, i32
  }
}

</mosaic_0001>

<bundles_post_ra>
// kernel: tpu_custom_call.1
= control target key start
LH: loop header
LB: loop body
LE: loop exit
PB: predicated region body
PF: predicated region fallthrough
CT: control target
= control target key end

     0   :  { %10 = vsyncpa [#allocation3], 0  ;;  %s642_s0 = inlined_call_operand.hbm [shape: f32[4,1024], index: 0, kind: input, shape index: {}]   ;;  %s643_s1 = inlined_call_operand.hbm [shape: f32[128,128], index: 1, kind: input, shape index: {}]   ;;  %s644_s2 = inlined_call_operand.vmem [shape: f32[1,128], index: 2, kind: input, shape index: {}]   ;;  %s645_s3 = inlined_call_operand.hbm [shape: f32[128,128], index: 3, kind: input, shape index: {}]   ;;  %s646_s4 = inlined_call_operand.vmem [shape: f32[1,128], index: 4, kind: input, shape index: {}]   ;;  %s647_s5 = inlined_call_operand.hbm [shape: f32[4,128], index: 5, kind: output, shape index: {}]  }
   0x1   :  { %11 = vsyncpa [#allocation6], 0 }
   0x2   :  { %12 = vsyncpa [#allocation4], 0  ;;  %s524_s18 = smov [#allocation5]   ;;  %s430_s22 = scalar_lea.hbm %s643_s1, 2048 }
   0x3   :  { %s28_s19 = sshll.u32 %s524_s18, 4  ;;  %p431_p0 = scmp.ne.s32.totalorder %s643_s1, %s430_s22  ;;  %s29_s19 = int_to_ptr.vmem [resolvable:$true] %s28_s19 }
   0x4   :  { %p434_p1 = scmp.lt.u32.totalorder %s430_s22, %s643_s1 }
   0x6   :  { %p436_p2 = pnand %p434_p1, %p431_p0 }
   0x8   :  { %439 = shalt.err (!%p436_p2)
}
   0x9   :  { %s440_s27 = scalar_lea.vmem %s29_s19, 2048  ;;  %p445_p4 = scmp.lt.s32.totalorder %s29_s19, %s29_s19 }
   0xa   :  { %p441_p3 = scmp.ne.s32.totalorder %s29_s19, %s440_s27  ;;  %p446_p5 = scmp.lt.s32.totalorder %s440_s27, %s440_s27 }
   0xc   :  { %p447_p6 = por %p446_p5, %p445_p4 }
   0xe   :  { %p448_p7 = pnand %p447_p6, %p441_p3 }
  0x10   :  { %451 = shalt.err (!%p448_p7)
}
  0x11   :  { %s525_s28 = smov 128   ;;  %s526_s29 = smov 8  }
  0x12   :  { %34 = dma.hbm_to_vmem [thread:$0]  %s643_s1, 2048, %s29_s19, [#allocation6], %s525_s28, %s525_s28, %s526_s29  }
  0x13   :  { %s527_s7 = smov [#allocation2]   ;;  %s528_s9 = smov [#allocation7]  }
  0x14   :  { %s19_s8 = sshll.u32 %s527_s7, 4  ;;  %s42_s10 = sshll.u32 %s528_s9, 4  ;;  %s20_s8 = int_to_ptr.vmem [resolvable:$true] %s19_s8  ;;  %s43_s10 = int_to_ptr.vmem [resolvable:$true] %s42_s10 }
  0x15   :  { %s452_s13 = scalar_lea.hbm %s642_s0, 64  ;;  %s454_s18 = scalar_lea.hbm %s642_s0, 512 }
  0x16   :  { %p453_p8 = scmp.ne.s32.totalorder %s642_s0, %s452_s13  ;;  %p455_p9 = scmp.lt.u32.totalorder %s454_s18, %s452_s13 }
  0x17   :  { %p456_p10 = scmp.lt.u32.totalorder %s452_s13, %s642_s0 }
  0x19   :  { %p457_p11 = por %p456_p10, %p455_p9 }
  0x1b   :  { %p458_p12 = pnand %p457_p11, %p453_p8 }
  0x1d   :  { %461 = shalt.err (!%p458_p12)
}
  0x1e   :  { %s462_s19 = scalar_lea.vmem %s20_s8, 64  ;;  %p467_p0 = scmp.lt.s32.totalorder %s20_s8, %s20_s8 }
  0x1f   :  { %p463_p13 = scmp.ne.s32.totalorder %s20_s8, %s462_s19  ;;  %p468_p1 = scmp.lt.s32.totalorder %s462_s19, %s462_s19 }
  0x21   :  { %p469_p2 = por %p468_p1, %p467_p0 }
  0x23   :  { %p470_p3 = pnand %p469_p2, %p463_p13 }
  0x25   :  { %473 = shalt.err (!%p470_p3)
}
  0x26   :  { %22 = dma.hbm_to_vmem [thread:$0]  %s642_s0, 64, %s20_s8, [#allocation3]  }
  0x27   :  { %s474_s25 = scalar_lea.hbm %s645_s3, 2048 }
  0x28   :  { %p475_p4 = scmp.ne.s32.totalorder %s645_s3, %s474_s25  ;;  %p478_p5 = scmp.lt.u32.totalorder %s474_s25, %s645_s3 }
  0x2a   :  { %p480_p6 = pnand %p478_p5, %p475_p4 }
  0x2c   :  { %483 = shalt.err (!%p480_p6)
}
  0x2d   :  { %s484_s7 = scalar_lea.vmem %s43_s10, 2048  ;;  %p489_p8 = scmp.lt.s32.totalorder %s43_s10, %s43_s10 }
  0x2e   :  { %p485_p7 = scmp.ne.s32.totalorder %s43_s10, %s484_s7  ;;  %p490_p9 = scmp.lt.s32.totalorder %s484_s7, %s484_s7 }
  0x30   :  { %p491_p10 = por %p490_p9, %p489_p8 }
  0x32   :  { %p492_p11 = pnand %p491_p10, %p485_p7 }
  0x34   :  { %495 = shalt.err (!%p492_p11)
}
  0x35   :  { %48 = dma.hbm_to_vmem [thread:$0]  %s645_s3, 2048, %s43_s10, [#allocation6], %s525_s28, %s525_s28, %s526_s29  }
  0x36   :  { %518 = dma.done.wait [#allocation3], 64  }
  0x37   :  { %519 = vsyncadd [#allocation3], 4294967232 }
  0x38   :  { %520 = dma.done.wait [#allocation6], 4096  }
  0x39   :  { %521 = vsyncadd [#allocation6], 4294963200  ;;  %v529_v0 = vmov 0.0|0.0   ;;  %vm530_vm0 = vmmov 0   ;;  %v531_v1 = vmov 0.0   ;;  %v61_v2 = vld [vmem:[#allocation5] sm:$0xff] }
  0x3a   :  { %371 = vmatprep.subr.bf16.mxu0 %v529_v0  ;;  %333 = vmatprep.mubr.msk.f32.mxu0 %vm530_vm0, %v531_v1  ;;  %v62_v3 = vld [vmem:[#allocation5 + $0x8] sm:$0xff]  ;;  %v63_v5 = vld [vmem:[#allocation5 + $0x10] sm:$0xff]  ;;  %v64_v6 = vld [vmem:[#allocation5 + $0x18] sm:$0xff]  ;;  %s532_s10 = smov [#allocation8]  }
  0x3b   :  { %395 = vmatprep.subr.bf16.mxu1 %v529_v0  ;;  %368 = vmatprep.mubr.msk.f32.mxu1 %vm530_vm0, %v531_v1  ;;  %v372_v4 = vpack.c.bf16 %v62_v3, %v61_v2  ;;  %v155_v7 = vld [vmem:[#allocation7] sm:$0xff]  ;;  %v156_v8 = vld [vmem:[#allocation7 + $0x8] sm:$0xff]  ;;  %v375_v9 = vpack.c.bf16 %v64_v6, %v63_v5  ;;  %v157_v11 = vld [vmem:[#allocation7 + $0x10] sm:$0xff]  ;;  %s255_s11 = sshll.u32 %s532_s10, 4  ;;  %s256_s11 = int_to_ptr.vmem [resolvable:$true] %s255_s11 }
  0x3c   :  { %v396_v10 = vpack.c.bf16 %v156_v8, %v155_v7  ;;  %v158_v12 = vld [vmem:[#allocation7 + $0x18] sm:$0xff]  ;;  %v65_v13 = vld [vmem:[#allocation5 + $0x20] sm:$0xff]  ;;  %v66_v14 = vld [vmem:[#allocation5 + $0x28] sm:$0xff]  ;;  %s496_s12 = scalar_lea.vmem %s256_s11, 64  ;;  %p501_p13 = scmp.lt.s32.totalorder %s256_s11, %s256_s11 }
  0x3d   :  { %373 = vmatpush3.bf16.xpose.msra.mxu0 %v372_v4  ;;  %v399_v15 = vpack.c.bf16 %v158_v12, %v157_v11  ;;  %v378_v16 = vpack.c.bf16 %v66_v14, %v65_v13  ;;  %v159_v17 = vld [vmem:[#allocation7 + $0x20] sm:$0xff]  ;;  %v160_v18 = vld [vmem:[#allocation7 + $0x28] sm:$0xff]  ;;  %v67_v19 = vld [vmem:[#allocation5 + $0x30] sm:$0xff]  ;;  %p497_p12 = scmp.ne.s32.totalorder %s256_s11, %s496_s12  ;;  %p502_p0 = scmp.lt.s32.totalorder %s496_s12, %s496_s12 }
  0x3e   :  { %374 = vmatprep.subr.bf16.mxu0 %v529_v0  ;;  %397 = vmatpush3.bf16.xpose.msra.mxu1 %v396_v10  ;;  %v68_v20 = vld [vmem:[#allocation5 + $0x38] sm:$0xff]  ;;  %v402_v21 = vpack.c.bf16 %v160_v18, %v159_v17  ;;  %v161_v23 = vld [vmem:[#allocation7 + $0x30] sm:$0xff]  ;;  %v69_v25 = vld [vmem:[#allocation5 + $0x40] sm:$0xff] }
  0x3f   :  { %398 = vmatprep.subr.bf16.mxu1 %v529_v0  ;;  %v381_v22 = vpack.c.bf16 %v68_v20, %v67_v19  ;;  %v162_v24 = vld [vmem:[#allocation7 + $0x38] sm:$0xff]  ;;  %v70_v26 = vld [vmem:[#allocation5 + $0x48] sm:$0xff]  ;;  %v163_v29 = vld [vmem:[#allocation7 + $0x40] sm:$0xff]  ;;  %p503_p1 = por %p502_p0, %p501_p13 }
  0x40   :  { %v405_v27 = vpack.c.bf16 %v162_v24, %v161_v23  ;;  %v384_v28 = vpack.c.bf16 %v70_v26, %v69_v25  ;;  %v164_v30 = vld [vmem:[#allocation7 + $0x48] sm:$0xff]  ;;  %v71_v31 = vld [vmem:[#allocation5 + $0x50] sm:$0xff]  ;;  %v72_v32 = vld [vmem:[#allocation5 + $0x58] sm:$0xff] }
  0x41   :  { %v408_v33 = vpack.c.bf16 %v164_v30, %v163_v29  ;;  %v387_v34 = vpack.c.bf16 %v72_v32, %v71_v31  ;;  %v165_v35 = vld [vmem:[#allocation7 + $0x50] sm:$0xff]  ;;  %v166_v36 = vld [vmem:[#allocation7 + $0x58] sm:$0xff]  ;;  %v73_v37 = vld [vmem:[#allocation5 + $0x60] sm:$0xff]  ;;  %p504_p2 = pnand %p503_p1, %p497_p12 }
  0x42   :  { %v74_v38 = vld [vmem:[#allocation5 + $0x68] sm:$0xff]  ;;  %v411_v39 = vpack.c.bf16 %v166_v36, %v165_v35  ;;  %v167_v41 = vld [vmem:[#allocation7 + $0x60] sm:$0xff]  ;;  %v75_v43 = vld [vmem:[#allocation5 + $0x70] sm:$0xff] }
  0x43   :  { %v390_v40 = vpack.c.bf16 %v74_v38, %v73_v37  ;;  %v168_v42 = vld [vmem:[#allocation7 + $0x68] sm:$0xff]  ;;  %v76_v44 = vld [vmem:[#allocation5 + $0x78] sm:$0xff]  ;;  %v169_v48 = vld [vmem:[#allocation7 + $0x70] sm:$0xff] }
  0x44   :  { %v414_v45 = vpack.c.bf16 %v168_v42, %v167_v41  ;;  %v393_v46 = vpack.c.bf16 %v76_v44, %v75_v43  ;;  %v60_v47 = vld [vmem:[#allocation2] sm:$0xf] }
  0x45   :  { %376 = vmatpush3.bf16.xpose.msra.mxu0 %v375_v9  ;;  %v170_v49 = vld [vmem:[#allocation7 + $0x78] sm:$0xff] }
  0x46   :  { %377 = vmatprep.subr.bf16.mxu0 %v529_v0  ;;  %400 = vmatpush3.bf16.xpose.msra.mxu1 %v399_v15  ;;  %v417_v50 = vpack.c.bf16 %v170_v49, %v169_v48  ;;  %v265_v51 = vld [vmem:[%s644_s2] ss:$0 sm:$0xff] }
  0x47   :  { %401 = vmatprep.subr.bf16.mxu1 %v529_v0  ;;  %v266_v56 = vld [vmem:[%s646_s4] ss:$0 sm:$0xff] }
  0x4d   :  { %379 = vmatpush3.bf16.xpose.msra.mxu0 %v378_v16 }
  0x4e   :  { %380 = vmatprep.subr.bf16.mxu0 %v529_v0  ;;  %403 = vmatpush3.bf16.xpose.msra.mxu1 %v402_v21 }
  0x4f   :  { %404 = vmatprep.subr.bf16.mxu1 %v529_v0 }
  0x55   :  { %382 = vmatpush3.bf16.xpose.msra.mxu0 %v381_v22 }
  0x56   :  { %383 = vmatprep.subr.bf16.mxu0 %v529_v0  ;;  %406 = vmatpush3.bf16.xpose.msra.mxu1 %v405_v27 }
  0x57   :  { %407 = vmatprep.subr.bf16.mxu1 %v529_v0 }
  0x5d   :  { %385 = vmatpush3.bf16.xpose.msra.mxu0 %v384_v28 }
  0x5e   :  { %386 = vmatprep.subr.bf16.mxu0 %v529_v0  ;;  %409 = vmatpush3.bf16.xpose.msra.mxu1 %v408_v33 }
  0x5f   :  { %410 = vmatprep.subr.bf16.mxu1 %v529_v0 }
  0x65   :  { %388 = vmatpush3.bf16.xpose.msra.mxu0 %v387_v34 }
  0x66   :  { %389 = vmatprep.subr.bf16.mxu0 %v529_v0  ;;  %412 = vmatpush3.bf16.xpose.msra.mxu1 %v411_v39 }
  0x67   :  { %413 = vmatprep.subr.bf16.mxu1 %v529_v0 }
  0x6d   :  { %391 = vmatpush3.bf16.xpose.msra.mxu0 %v390_v40 }
  0x6e   :  { %392 = vmatprep.subr.bf16.mxu0 %v529_v0  ;;  %415 = vmatpush3.bf16.xpose.msra.mxu1 %v414_v45 }
  0x6f   :  { %416 = vmatprep.subr.bf16.mxu1 %v529_v0 }
  0x75   :  { %394 = vmatpush3.bf16.xpose.msra.mxu0 %v393_v46 }
  0x76   :  { %418 = vmatpush3.bf16.xpose.msra.mxu1 %v417_v50 }
  0x7c   :  { %334 = vmatmul.mubr.f32.vlgmr.msra.gmra.mrb[0].mxu0 %v60_v47 }
 0x14f   :  { %v150_v52 = vpop.f32.mrb[0].mxu0 }
 0x150   :  { %v151_v53 = vadd.f32 %v265_v51, %v150_v52  ;;  %v335_v54 = vpop.f32.mrb[1].mxu0 }
 0x152   :  { %428 = vtanh.f32 %v151_v53 }
 0x15c   :  { %v429_v55 = vpop.eup %428 }
 0x15d   :  { %369 = vmatmul.mubr.f32.vlgmr.msra.gmra.mrb[0].mxu1 %v429_v55 }
 0x230   :  { %v244_v57 = vpop.f32.mrb[0].mxu1 }
 0x231   :  { %v245_v58 = vadd.f32 %v266_v56, %v244_v57  ;;  %v370_v59 = vpop.f32.mrb[1].mxu1 }
 0x233   :  { %248 = vst [vmem:[#allocation8] sm:$0xf] %v245_v58 }
 0x234   :  { %507 = shalt.err (!%p504_p2)
}
 0x235   :  { %s508_s14 = scalar_lea.hbm %s647_s5, 64 }
 0x236   :  { %p509_p3 = scmp.ne.s32.totalorder %s647_s5, %s508_s14  ;;  %p512_p4 = scmp.lt.u32.totalorder %s508_s14, %s647_s5 }
 0x238   :  { %p514_p5 = pnand %p512_p4, %p509_p3 }
 0x23a   :  { %517 = shalt.err (!%p514_p5)
}
 0x23b   :  { %258 = dma.vmem_to_hbm [thread:$0]  %s256_s11, 64, %s647_s5, [#allocation4]  }
 0x23c   :  { %522 = dma.done.wait [#allocation4], 64  }
 0x23d   :  { %523 = vsyncadd [#allocation4], 4294967232 }
 0x23e   :  { %262 = vsyncpa [#allocation3], 1 }
 0x23f   :  { %263 = vsyncpa [#allocation6], 1 }
 0x240   :  { %264 = vsyncpa [#allocation4], 1 }

</bundles_post_ra>
